<compile_context>
chip_gen: v6e
topology: v6e:2x2x1
jax: 0.10.0
libtpu: 0.0.40
codegen_flags: <defaults>
</compile_context>

<pallas_src>
import jax
import jax.numpy as jnp
from jax.experimental import pallas as pl
from jax.experimental.pallas import tpu as pltpu


def _make_temporal_block_kernel(*, c_in, c_out, t_l, ksize, dilation, padding,
                                has_down):
    tp = t_l + padding            # h1 columns computed per tile (tile + causal halo)

    def kernel(x_ref, halo_ref, w1_ref, b1_ref, w2_ref, b2_ref, *rest):
        if has_down:
            bd_ref, o_ref = rest
        else:
            (o_ref,) = rest
            bd_ref = None

        xt = x_ref[0]                                  # (c_in, t_l)        bf16
        hl = halo_ref[0, 0]                            # (c_in, 2*padding)  bf16
        xe = jnp.concatenate([hl, xt], axis=1)         # (c_in, 2*padding + t_l)

        # ---- conv1 (+ fused 1x1 downsample rows): ONE stacked MXU matmul ----
        # s1 row-block k holds x shifted by k*dilation (causal left-pad comes
        # from the halo, which is zero before the sequence start).
        s1 = jnp.concatenate(
            [xe[:, k * dilation:k * dilation + tp] for k in range(ksize)], axis=0)
        acc1 = jnp.dot(w1_ref[...], s1,
                       preferred_element_type=jnp.float32)   # (R1, tp) f32

        h1 = jnp.maximum(acc1[:c_out] + b1_ref[...], 0.0)    # relu1
        # Emulate conv2's zero left-padding: h1 positions before the sequence
        # start must be exactly zero (only affects the first L-tile).
        t0 = pl.program_id(1) * t_l
        col = jax.lax.broadcasted_iota(jnp.int32, (1, tp), 1)
        h1 = jnp.where(col < padding - t0, 0.0, h1)
        h1b = h1.astype(jnp.bfloat16)
        # TODO(synk): dropout1/dropout2 are identity (inference semantics);
        # training-mode dropout would use pltpu.prng_seed / pltpu.prng_random_bits.

        # ---- conv2: ONE stacked MXU matmul, then relu2 -----------------------
        s2 = jnp.concatenate(
            [h1b[:, k * dilation:k * dilation + t_l] for k in range(ksize)], axis=0)
        h2 = jnp.dot(w2_ref[...], s2,
                     preferred_element_type=jnp.float32) + b2_ref[...]
        out_net = jnp.maximum(h2, 0.0)                        # relu2

        # ---- residual + final ReLU ------------------------------------------
        if has_down:
            # downsample rows were fused into acc1; columns [padding:] align
            # with this output tile.
            res = acc1[c_out:, padding:] + bd_ref[...]
        else:
            res = xt.astype(jnp.float32)
        o_ref[0] = jnp.maximum(out_net + res, 0.0).astype(o_ref.dtype)

    return kernel


def _vmem_limit_bytes():
    try:
        cap = pltpu.get_tpu_info().vmem_capacity_bytes
        return min(64 * 1024 * 1024, int(cap) * 3 // 4)
    except Exception:
        return None


def temporal_block(x, w1, b1, w2, b2, wd=None, bd=None, *,
                   kernel_size, stride=1, dilation, padding, tile_l=None):
    """Fused TemporalBlock forward. x: (N, C_in, L) -> (N, C_out, L)."""
    # TODO(synk): stride != 1 changes the chomp/output-length arithmetic; TCN uses 1.
    assert stride == 1, "only stride=1 is supported"
    assert padding == (kernel_size - 1) * dilation, "causal TCN padding expected"
    assert padding > 0, "kernel_size must be >= 2"

    n, c_in, l = x.shape
    c_out = w1.shape[0]
    ksz = kernel_size
    assert w1.shape == (c_out, c_in, ksz)
    assert w2.shape == (c_out, c_out, ksz)
    has_down = wd is not None
    assert has_down == (c_in != c_out)

    # ---- lane-dense L tiling ------------------------------------------------
    if tile_l is None:
        tile_l = next((t for t in (1024, 512, 256, 128) if l % t == 0), l)
    assert l % tile_l == 0 and (tile_l == l or tile_l % 128 == 0)
    num_tiles = l // tile_l
    halo = 2 * padding            # x-halo needed to recompute the h1 halo

    # ---- operands: bf16 for the MXU, f32 biases ------------------------------
    x_bf = x.astype(jnp.bfloat16)
    # Stacked weight layout: column block k holds tap k -> matches s1/s2 rows.
    w1_s = jnp.transpose(w1, (0, 2, 1)).reshape(c_out, ksz * c_in)
    w2_s = jnp.transpose(w2, (0, 2, 1)).reshape(c_out, ksz * c_out).astype(jnp.bfloat16)
    if has_down:
        if wd.ndim == 3:
            wd = wd[:, :, 0]
        # Fuse the 1x1 downsample as extra rows multiplying only the last
        # (unshifted) tap block of the stacked conv1 operand.
        down_rows = jnp.concatenate(
            [jnp.zeros((c_out, (ksz - 1) * c_in), w1_s.dtype), wd], axis=1)
        w1_full = jnp.concatenate([w1_s, down_rows], axis=0)
    else:
        w1_full = w1_s
    w1_full = w1_full.astype(jnp.bfloat16)
    b1_c = b1.reshape(c_out, 1).astype(jnp.float32)
    b2_c = b2.reshape(c_out, 1).astype(jnp.float32)

    # ---- causal halo: the 2*padding columns left of each L tile --------------
    xpad = jnp.pad(x_bf, ((0, 0), (0, 0), (halo, 0)))
    idx = (jnp.arange(num_tiles) * tile_l)[:, None] + jnp.arange(halo)[None, :]
    x_halo = jnp.transpose(xpad[:, :, idx], (0, 2, 1, 3))   # (n, num_tiles, c_in, halo)

    kernel = _make_temporal_block_kernel(
        c_in=c_in, c_out=c_out, t_l=tile_l, ksize=ksz,
        dilation=dilation, padding=padding, has_down=has_down)

    args = [x_bf, x_halo, w1_full, b1_c, w2_s, b2_c]
    if has_down:
        args.append(bd.reshape(c_out, 1).astype(jnp.float32))

    def build(single_buffer_weights):
        def const_spec(shape):
            imap = lambda i, j: (0,) * len(shape)
            if single_buffer_weights:
                return pl.BlockSpec(shape, imap, pipeline_mode=pl.Buffered(1))
            return pl.BlockSpec(shape, imap)

        in_specs = [
            pl.BlockSpec((1, c_in, tile_l), lambda i, j: (i, 0, j)),        # x tile
            pl.BlockSpec((1, 1, c_in, halo), lambda i, j: (i, j, 0, 0)),    # x halo
            const_spec(w1_full.shape),                                      # w1 (stacked)
            const_spec(b1_c.shape),                                         # b1
            const_spec(w2_s.shape),                                         # w2 (stacked)
            const_spec(b2_c.shape),                                         # b2
        ]
        if has_down:
            in_specs.append(const_spec((c_out, 1)))                         # bd

        return pl.pallas_call(
            kernel,
            out_shape=jax.ShapeDtypeStruct((n, c_out, l), x.dtype),
            grid=(n, num_tiles),
            in_specs=in_specs,
            out_specs=pl.BlockSpec((1, c_out, tile_l), lambda i, j: (i, 0, j)),
            compiler_params=pltpu.CompilerParams(
                dimension_semantics=("parallel", "parallel"),
                vmem_limit_bytes=_vmem_limit_bytes()),
        )

    try:
        return build(True)(*args)
    except Exception:
        # pl.Buffered(1) single-buffering of constant weight blocks not available
        # on this jax version -> fall back to default double-buffered specs.
        return build(False)(*args)


# ----------------------------- reference & test -------------------------------
def _reference(x, w1, b1, w2, b2, wd, bd, padding, dilation):
    """Pure-JAX reference matching PyTorch (conv pad-both-sides + chomp), with the
    kernel's bf16 operand rounding mirrored so the comparison stays tight."""
    def conv1d(xx, ww, bb, pad, dil):
        y = jax.lax.conv_general_dilated(
            xx, ww, window_strides=(1,), padding=[(pad, pad)],
            rhs_dilation=(dil,), dimension_numbers=("NCH", "OIH", "NCH"))
        return y + bb[None, :, None]

    f32 = jnp.float32
    xb = x.astype(jnp.bfloat16).astype(f32)
    w1b = w1.astype(jnp.bfloat16).astype(f32)
    w2b = w2.astype(jnp.bfloat16).astype(f32)
    h1 = jax.nn.relu(conv1d(xb, w1b, b1, padding, dilation)[:, :, :-padding])
    h1 = h1.astype(jnp.bfloat16).astype(f32)
    h2 = conv1d(h1, w2b, b2, padding, dilation)[:, :, :-padding]
    out_net = jax.nn.relu(h2)                      # relu2 (dropout = identity in eval)
    if wd is None:
        res = xb
    else:
        wdb = wd.astype(jnp.bfloat16).astype(f32)
        res = conv1d(xb, wdb, bd, 0, 1)
    return jax.nn.relu(out_net + res)


if __name__ == "__main__":
    key = jax.random.PRNGKey(0)
    N, L = 2, 256
    K, STRIDE, DILATION = 3, 1, 2
    PADDING = (K - 1) * DILATION  # 4

    def run_case(case_key, c_in, c_out):
        ks = jax.random.split(case_key, 7)
        x = jax.random.normal(ks[0], (N, c_in, L), jnp.float32)
        w1 = 0.01 * jax.random.normal(ks[1], (c_out, c_in, K), jnp.float32)
        b1 = 0.01 * jax.random.normal(ks[2], (c_out,), jnp.float32)
        w2 = 0.01 * jax.random.normal(ks[3], (c_out, c_out, K), jnp.float32)
        b2 = 0.01 * jax.random.normal(ks[4], (c_out,), jnp.float32)
        if c_in != c_out:
            wd = 0.01 * jax.random.normal(ks[5], (c_out, c_in, 1), jnp.float32)
            bd = 0.01 * jax.random.normal(ks[6], (c_out,), jnp.float32)
        else:
            wd = bd = None

        out = temporal_block(x, w1, b1, w2, b2, wd, bd,
                             kernel_size=K, stride=STRIDE, dilation=DILATION,
                             padding=PADDING, tile_l=128)
        out = jax.block_until_ready(out)

        ref = _reference(x, w1, b1, w2, b2, wd, bd, PADDING, DILATION)
        assert out.shape == ref.shape == (N, c_out, L)
        err = float(jnp.max(jnp.abs(out - ref)))
        assert jnp.allclose(out, ref, atol=2e-3, rtol=2e-3), f"max |err| = {err}"

    k1, k2 = jax.random.split(key)
    run_case(k1, 16, 32)   # residual via fused 1x1 downsample
    run_case(k2, 32, 32)   # identity residual
    print("KERNEL_OK")
</pallas_src>

<mosaic_0001>
module attributes {stable_mosaic.version = 11 : i64} {
  func.func @kernel(%arg0: i32, %arg1: i32, %arg2: memref<1x16x128xbf16, #tpu.memory_space<vmem>>, %arg3: memref<1x1x16x8xbf16, #tpu.memory_space<vmem>>, %arg4: memref<64x48xbf16, #tpu.memory_space<vmem>>, %arg5: memref<32x1xf32, #tpu.memory_space<vmem>>, %arg6: memref<32x96xbf16, #tpu.memory_space<vmem>>, %arg7: memref<32x1xf32, #tpu.memory_space<vmem>>, %arg8: memref<32x1xf32, #tpu.memory_space<vmem>>, %arg9: memref<1x32x128xf32, #tpu.memory_space<vmem>>) attributes {dimension_semantics = [#tpu.dimension_semantics<parallel>, #tpu.dimension_semantics<parallel>], iteration_bounds = array<i64: 2, 2>, scalar_prefetch = 0 : i64, scratch_operands = 0 : i64, tpu.core_type = #tpu.core_type<tc>, window_params = [{transform_indices = @transform_0, window_bounds = array<i64: 1, 16, 128>}, {transform_indices = @transform_1, window_bounds = array<i64: 1, 1, 16, 8>}, {pipeline_mode = #tpu.pipeline_mode<synchronous>, transform_indices = @transform_2, window_bounds = array<i64: 64, 48>}, {pipeline_mode = #tpu.pipeline_mode<synchronous>, transform_indices = @transform_3, window_bounds = array<i64: 32, 1>}, {pipeline_mode = #tpu.pipeline_mode<synchronous>, transform_indices = @transform_4, window_bounds = array<i64: 32, 96>}, {pipeline_mode = #tpu.pipeline_mode<synchronous>, transform_indices = @transform_5, window_bounds = array<i64: 32, 1>}, {pipeline_mode = #tpu.pipeline_mode<synchronous>, transform_indices = @transform_6, window_bounds = array<i64: 32, 1>}, {transform_indices = @transform_7, window_bounds = array<i64: 1, 32, 128>}]} {
    %c0 = arith.constant 0 : index
    %c0_0 = arith.constant 0 : index
    %c0_1 = arith.constant 0 : index
    %0 = vector.load %arg2[%c0, %c0_0, %c0_1] : memref<1x16x128xbf16, #tpu.memory_space<vmem>>, vector<1x16x128xbf16>
    %1 = vector.shape_cast %0 : vector<1x16x128xbf16> to vector<16x128xbf16>
    %c0_2 = arith.constant 0 : index
    %c0_3 = arith.constant 0 : index
    %c0_4 = arith.constant 0 : index
    %c0_5 = arith.constant 0 : index
    %2 = vector.load %arg3[%c0_2, %c0_3, %c0_4, %c0_5] : memref<1x1x16x8xbf16, #tpu.memory_space<vmem>>, vector<1x1x16x8xbf16>
    %3 = vector.shape_cast %2 : vector<1x1x16x8xbf16> to vector<16x8xbf16>
    %4 = tpu.concatenate %3, %1 in 1 : vector<16x8xbf16>, vector<16x128xbf16> -> vector<16x136xbf16>
    %5 = vector.extract_strided_slice %4 {offsets = [0, 0], sizes = [16, 132], strides = [1, 1]} : vector<16x136xbf16> to vector<16x132xbf16>
    %6 = vector.extract_strided_slice %4 {offsets = [0, 2], sizes = [16, 132], strides = [1, 1]} : vector<16x136xbf16> to vector<16x132xbf16>
    %7 = vector.extract_strided_slice %4 {offsets = [0, 4], sizes = [16, 132], strides = [1, 1]} : vector<16x136xbf16> to vector<16x132xbf16>
    %8 = tpu.concatenate %5, %6, %7 in 0 : vector<16x132xbf16>, vector<16x132xbf16>, vector<16x132xbf16> -> vector<48x132xbf16>
    %c0_6 = arith.constant 0 : index
    %c0_7 = arith.constant 0 : index
    %9 = vector.load %arg4[%c0_6, %c0_7] : memref<64x48xbf16, #tpu.memory_space<vmem>>, vector<64x48xbf16>
    %cst = arith.constant dense<0.000000e+00> : vector<64x132xf32>
    %10 = tpu.matmul %9, %8, %cst {dimension_numbers = #tpu.dot_dimension_numbers<[1], [0], [0], [1], [0, 0, 1, 1], [], []>} : vector<64x48xbf16>, vector<48x132xbf16>, vector<64x132xf32> -> vector<64x132xf32>
    %11 = vector.extract_strided_slice %10 {offsets = [0, 0], sizes = [32, 132], strides = [1, 1]} : vector<64x132xf32> to vector<32x132xf32>
    %c0_8 = arith.constant 0 : index
    %c0_9 = arith.constant 0 : index
    %12 = vector.load %arg5[%c0_8, %c0_9] : memref<32x1xf32, #tpu.memory_space<vmem>>, vector<32x1xf32>
    %13 = vector.broadcast %12 : vector<32x1xf32> to vector<32x132xf32>
    %14 = arith.addf %11, %13 : vector<32x132xf32>
    %cst_10 = arith.constant 0.000000e+00 : f32
    %15 = vector.broadcast %cst_10 : f32 to vector<32x132xf32>
    %16 = arith.maximumf %14, %15 : vector<32x132xf32>
    %c128_i32 = arith.constant 128 : i32
    %17 = arith.muli %arg1, %c128_i32 : i32
    %18 = tpu.iota {dimensions = array<i32: 1>} : vector<1x132xi32>
    %c4_i32 = arith.constant 4 : i32
    %19 = arith.subi %c4_i32, %17 : i32
    %20 = vector.broadcast %19 : i32 to vector<1x132xi32>
    %21 = arith.cmpi slt, %18, %20 : vector<1x132xi32>
    %cst_11 = arith.constant 0.000000e+00 : f32
    %22 = vector.shape_cast %21 : vector<1x132xi1> to vector<1x132xi1>
    %23 = vector.broadcast %22 : vector<1x132xi1> to vector<32x132xi1>
    %24 = vector.broadcast %cst_11 : f32 to vector<32x132xf32>
    %25 = arith.select %23, %24, %16 : vector<32x132xi1>, vector<32x132xf32>
    %26 = arith.truncf %25 : vector<32x132xf32> to vector<32x132xbf16>
    %27 = vector.extract_strided_slice %26 {offsets = [0, 0], sizes = [32, 128], strides = [1, 1]} : vector<32x132xbf16> to vector<32x128xbf16>
    %28 = vector.extract_strided_slice %26 {offsets = [0, 2], sizes = [32, 128], strides = [1, 1]} : vector<32x132xbf16> to vector<32x128xbf16>
    %29 = vector.extract_strided_slice %26 {offsets = [0, 4], sizes = [32, 128], strides = [1, 1]} : vector<32x132xbf16> to vector<32x128xbf16>
    %30 = tpu.concatenate %27, %28, %29 in 0 : vector<32x128xbf16>, vector<32x128xbf16>, vector<32x128xbf16> -> vector<96x128xbf16>
    %c0_12 = arith.constant 0 : index
    %c0_13 = arith.constant 0 : index
    %31 = vector.load %arg6[%c0_12, %c0_13] : memref<32x96xbf16, #tpu.memory_space<vmem>>, vector<32x96xbf16>
    %cst_14 = arith.constant dense<0.000000e+00> : vector<32x128xf32>
    %32 = tpu.matmul %31, %30, %cst_14 {dimension_numbers = #tpu.dot_dimension_numbers<[1], [0], [0], [1], [0, 0, 1, 1], [], []>} : vector<32x96xbf16>, vector<96x128xbf16>, vector<32x128xf32> -> vector<32x128xf32>
    %c0_15 = arith.constant 0 : index
    %c0_16 = arith.constant 0 : index
    %33 = vector.load %arg7[%c0_15, %c0_16] : memref<32x1xf32, #tpu.memory_space<vmem>>, vector<32x1xf32>
    %34 = vector.broadcast %33 : vector<32x1xf32> to vector<32x128xf32>
    %35 = arith.addf %32, %34 : vector<32x128xf32>
    %cst_17 = arith.constant 0.000000e+00 : f32
    %36 = vector.broadcast %cst_17 : f32 to vector<32x128xf32>
    %37 = arith.maximumf %35, %36 : vector<32x128xf32>
    %38 = vector.extract_strided_slice %10 {offsets = [32, 4], sizes = [32, 128], strides = [1, 1]} : vector<64x132xf32> to vector<32x128xf32>
    %c0_18 = arith.constant 0 : index
    %c0_19 = arith.constant 0 : index
    %39 = vector.load %arg8[%c0_18, %c0_19] : memref<32x1xf32, #tpu.memory_space<vmem>>, vector<32x1xf32>
    %40 = vector.broadcast %39 : vector<32x1xf32> to vector<32x128xf32>
    %41 = arith.addf %38, %40 : vector<32x128xf32>
    %42 = arith.addf %37, %41 : vector<32x128xf32>
    %cst_20 = arith.constant 0.000000e+00 : f32
    %43 = vector.broadcast %cst_20 : f32 to vector<32x128xf32>
    %44 = arith.maximumf %42, %43 : vector<32x128xf32>
    %c0_21 = arith.constant 0 : index
    %c0_22 = arith.constant 0 : index
    %c0_23 = arith.constant 0 : index
    %45 = vector.load %arg9[%c0_21, %c0_22, %c0_23] : memref<1x32x128xf32, #tpu.memory_space<vmem>>, vector<1x32x128xf32>
    %46 = vector.shape_cast %45 : vector<1x32x128xf32> to vector<32x128xf32>
    %47 = vector.shape_cast %44 : vector<32x128xf32> to vector<1x32x128xf32>
    tpu.vector_store %arg9[%c0_21, %c0_22, %c0_23], %47 {strides = array<i32>} : memref<1x32x128xf32, #tpu.memory_space<vmem>>, vector<1x32x128xf32>,
    return
  }
  func.func @transform_0(%arg0: i32, %arg1: i32) -> (i32, i32, i32) {
    %c0_i32 = arith.constant 0 : i32
    %c0_i32_0 = arith.constant 0 : i32
    return %arg0, %c0_i32, %arg1 : i32, i32, i32
  }
  func.func @transform_1(%arg0: i32, %arg1: i32) -> (i32, i32, i32, i32) {
    %c0_i32 = arith.constant 0 : i32
    %c0_i32_0 = arith.constant 0 : i32
    %c0_i32_1 = arith.constant 0 : i32
    return %arg0, %arg1, %c0_i32, %c0_i32_0 : i32, i32, i32, i32
  }
  func.func @transform_2(%arg0: i32, %arg1: i32) -> (i32, i32) {
    %c0_i32 = arith.constant 0 : i32
    %c0_i32_0 = arith.constant 0 : i32
    %c0_i32_1 = arith.constant 0 : i32
    return %c0_i32, %c0_i32_0 : i32, i32
  }
  func.func @transform_3(%arg0: i32, %arg1: i32) -> (i32, i32) {
    %c0_i32 = arith.constant 0 : i32
    %c0_i32_0 = arith.constant 0 : i32
    %c0_i32_1 = arith.constant 0 : i32
    return %c0_i32, %c0_i32_0 : i32, i32
  }
  func.func @transform_4(%arg0: i32, %arg1: i32) -> (i32, i32) {
    %c0_i32 = arith.constant 0 : i32
    %c0_i32_0 = arith.constant 0 : i32
    %c0_i32_1 = arith.constant 0 : i32
    return %c0_i32, %c0_i32_0 : i32, i32
  }
  func.func @transform_5(%arg0: i32, %arg1: i32) -> (i32, i32) {
    %c0_i32 = arith.constant 0 : i32
    %c0_i32_0 = arith.constant 0 : i32
    %c0_i32_1 = arith.constant 0 : i32
    return %c0_i32, %c0_i32_0 : i32, i32
  }
  func.func @transform_6(%arg0: i32, %arg1: i32) -> (i32, i32) {
    %c0_i32 = arith.constant 0 : i32
    %c0_i32_0 = arith.constant 0 : i32
    %c0_i32_1 = arith.constant 0 : i32
    return %c0_i32, %c0_i32_0 : i32, i32
  }
  func.func @transform_7(%arg0: i32, %arg1: i32) -> (i32, i32, i32) {
    %c0_i32 = arith.constant 0 : i32
    %c0_i32_0 = arith.constant 0 : i32
    return %arg0, %c0_i32, %arg1 : i32, i32, i32
  }
}

module attributes {stable_mosaic.version = 11 : i64} {
  func.func @kernel(%arg0: i32, %arg1: i32, %arg2: memref<1x16x128xbf16, #tpu.memory_space<vmem>>, %arg3: memref<1x1x16x8xbf16, #tpu.memory_space<vmem>>, %arg4: memref<64x48xbf16, #tpu.memory_space<vmem>>, %arg5: memref<32x1xf32, #tpu.memory_space<vmem>>, %arg6: memref<32x96xbf16, #tpu.memory_space<vmem>>, %arg7: memref<32x1xf32, #tpu.memory_space<vmem>>, %arg8: memref<32x1xf32, #tpu.memory_space<vmem>>, %arg9: memref<1x32x128xf32, #tpu.memory_space<vmem>>) attributes {dimension_semantics = [#tpu.dimension_semantics<parallel>, #tpu.dimension_semantics<parallel>], iteration_bounds = array<i64: 2, 2>, scalar_prefetch = 0 : i64, scratch_operands = 0 : i64, tpu.core_type = #tpu.core_type<tc>, window_params = [{transform_indices = @transform_0, window_bounds = array<i64: 1, 16, 128>}, {transform_indices = @transform_1, window_bounds = array<i64: 1, 1, 16, 8>}, {pipeline_mode = #tpu.pipeline_mode<synchronous>, transform_indices = @transform_2, window_bounds = array<i64: 64, 48>}, {pipeline_mode = #tpu.pipeline_mode<synchronous>, transform_indices = @transform_3, window_bounds = array<i64: 32, 1>}, {pipeline_mode = #tpu.pipeline_mode<synchronous>, transform_indices = @transform_4, window_bounds = array<i64: 32, 96>}, {pipeline_mode = #tpu.pipeline_mode<synchronous>, transform_indices = @transform_5, window_bounds = array<i64: 32, 1>}, {pipeline_mode = #tpu.pipeline_mode<synchronous>, transform_indices = @transform_6, window_bounds = array<i64: 32, 1>}, {transform_indices = @transform_7, window_bounds = array<i64: 1, 32, 128>}]} {
    %c0 = arith.constant 0 : index
    %c0_0 = arith.constant 0 : index
    %c0_1 = arith.constant 0 : index
    %0 = vector.load %arg2[%c0, %c0_0, %c0_1] : memref<1x16x128xbf16, #tpu.memory_space<vmem>>, vector<1x16x128xbf16>
    %1 = vector.shape_cast %0 : vector<1x16x128xbf16> to vector<16x128xbf16>
    %c0_2 = arith.constant 0 : index
    %c0_3 = arith.constant 0 : index
    %c0_4 = arith.constant 0 : index
    %c0_5 = arith.constant 0 : index
    %2 = vector.load %arg3[%c0_2, %c0_3, %c0_4, %c0_5] : memref<1x1x16x8xbf16, #tpu.memory_space<vmem>>, vector<1x1x16x8xbf16>
    %3 = vector.shape_cast %2 : vector<1x1x16x8xbf16> to vector<16x8xbf16>
    %4 = tpu.concatenate %3, %1 in 1 : vector<16x8xbf16>, vector<16x128xbf16> -> vector<16x136xbf16>
    %5 = vector.extract_strided_slice %4 {offsets = [0, 0], sizes = [16, 132], strides = [1, 1]} : vector<16x136xbf16> to vector<16x132xbf16>
    %6 = vector.extract_strided_slice %4 {offsets = [0, 2], sizes = [16, 132], strides = [1, 1]} : vector<16x136xbf16> to vector<16x132xbf16>
    %7 = vector.extract_strided_slice %4 {offsets = [0, 4], sizes = [16, 132], strides = [1, 1]} : vector<16x136xbf16> to vector<16x132xbf16>
    %8 = tpu.concatenate %5, %6, %7 in 0 : vector<16x132xbf16>, vector<16x132xbf16>, vector<16x132xbf16> -> vector<48x132xbf16>
    %c0_6 = arith.constant 0 : index
    %c0_7 = arith.constant 0 : index
    %9 = vector.load %arg4[%c0_6, %c0_7] : memref<64x48xbf16, #tpu.memory_space<vmem>>, vector<64x48xbf16>
    %cst = arith.constant dense<0.000000e+00> : vector<64x132xf32>
    %10 = tpu.matmul %9, %8, %cst {dimension_numbers = #tpu.dot_dimension_numbers<[1], [0], [0], [1], [0, 0, 1, 1], [], []>} : vector<64x48xbf16>, vector<48x132xbf16>, vector<64x132xf32> -> vector<64x132xf32>
    %11 = vector.extract_strided_slice %10 {offsets = [0, 0], sizes = [32, 132], strides = [1, 1]} : vector<64x132xf32> to vector<32x132xf32>
    %c0_8 = arith.constant 0 : index
    %c0_9 = arith.constant 0 : index
    %12 = vector.load %arg5[%c0_8, %c0_9] : memref<32x1xf32, #tpu.memory_space<vmem>>, vector<32x1xf32>
    %13 = vector.broadcast %12 : vector<32x1xf32> to vector<32x132xf32>
    %14 = arith.addf %11, %13 : vector<32x132xf32>
    %cst_10 = arith.constant 0.000000e+00 : f32
    %15 = vector.broadcast %cst_10 : f32 to vector<32x132xf32>
    %16 = arith.maximumf %14, %15 : vector<32x132xf32>
    %c128_i32 = arith.constant 128 : i32
    %17 = arith.muli %arg1, %c128_i32 : i32
    %18 = tpu.iota {dimensions = array<i32: 1>} : vector<1x132xi32>
    %c4_i32 = arith.constant 4 : i32
    %19 = arith.subi %c4_i32, %17 : i32
    %20 = vector.broadcast %19 : i32 to vector<1x132xi32>
    %21 = arith.cmpi slt, %18, %20 : vector<1x132xi32>
    %cst_11 = arith.constant 0.000000e+00 : f32
    %22 = vector.shape_cast %21 : vector<1x132xi1> to vector<1x132xi1>
    %23 = vector.broadcast %22 : vector<1x132xi1> to vector<32x132xi1>
    %24 = vector.broadcast %cst_11 : f32 to vector<32x132xf32>
    %25 = arith.select %23, %24, %16 : vector<32x132xi1>, vector<32x132xf32>
    %26 = arith.truncf %25 : vector<32x132xf32> to vector<32x132xbf16>
    %27 = vector.extract_strided_slice %26 {offsets = [0, 0], sizes = [32, 128], strides = [1, 1]} : vector<32x132xbf16> to vector<32x128xbf16>
    %28 = vector.extract_strided_slice %26 {offsets = [0, 2], sizes = [32, 128], strides = [1, 1]} : vector<32x132xbf16> to vector<32x128xbf16>
    %29 = vector.extract_strided_slice %26 {offsets = [0, 4], sizes = [32, 128], strides = [1, 1]} : vector<32x132xbf16> to vector<32x128xbf16>
    %30 = tpu.concatenate %27, %28, %29 in 0 : vector<32x128xbf16>, vector<32x128xbf16>, vector<32x128xbf16> -> vector<96x128xbf16>
    %c0_12 = arith.constant 0 : index
    %c0_13 = arith.constant 0 : index
    %31 = vector.load %arg6[%c0_12, %c0_13] : memref<32x96xbf16, #tpu.memory_space<vmem>>, vector<32x96xbf16>
    %cst_14 = arith.constant dense<0.000000e+00> : vector<32x128xf32>
    %32 = tpu.matmul %31, %30, %cst_14 {dimension_numbers = #tpu.dot_dimension_numbers<[1], [0], [0], [1], [0, 0, 1, 1], [], []>} : vector<32x96xbf16>, vector<96x128xbf16>, vector<32x128xf32> -> vector<32x128xf32>
    %c0_15 = arith.constant 0 : index
    %c0_16 = arith.constant 0 : index
    %33 = vector.load %arg7[%c0_15, %c0_16] : memref<32x1xf32, #tpu.memory_space<vmem>>, vector<32x1xf32>
    %34 = vector.broadcast %33 : vector<32x1xf32> to vector<32x128xf32>
    %35 = arith.addf %32, %34 : vector<32x128xf32>
    %cst_17 = arith.constant 0.000000e+00 : f32
    %36 = vector.broadcast %cst_17 : f32 to vector<32x128xf32>
    %37 = arith.maximumf %35, %36 : vector<32x128xf32>
    %38 = vector.extract_strided_slice %10 {offsets = [32, 4], sizes = [32, 128], strides = [1, 1]} : vector<64x132xf32> to vector<32x128xf32>
    %c0_18 = arith.constant 0 : index
    %c0_19 = arith.constant 0 : index
    %39 = vector.load %arg8[%c0_18, %c0_19] : memref<32x1xf32, #tpu.memory_space<vmem>>, vector<32x1xf32>
    %40 = vector.broadcast %39 : vector<32x1xf32> to vector<32x128xf32>
    %41 = arith.addf %38, %40 : vector<32x128xf32>
    %42 = arith.addf %37, %41 : vector<32x128xf32>
    %cst_20 = arith.constant 0.000000e+00 : f32
    %43 = vector.broadcast %cst_20 : f32 to vector<32x128xf32>
    %44 = arith.maximumf %42, %43 : vector<32x128xf32>
    %c0_21 = arith.constant 0 : index
    %c0_22 = arith.constant 0 : index
    %c0_23 = arith.constant 0 : index
    %45 = vector.load %arg9[%c0_21, %c0_22, %c0_23] : memref<1x32x128xf32, #tpu.memory_space<vmem>>, vector<1x32x128xf32>
    %46 = vector.shape_cast %45 : vector<1x32x128xf32> to vector<32x128xf32>
    %47 = vector.shape_cast %44 : vector<32x128xf32> to vector<1x32x128xf32>
    tpu.vector_store %arg9[%c0_21, %c0_22, %c0_23], %47 {strides = array<i32>} : memref<1x32x128xf32, #tpu.memory_space<vmem>>, vector<1x32x128xf32>,
    return
  }
  func.func @transform_0(%arg0: i32, %arg1: i32) -> (i32, i32, i32) {
    %c0_i32 = arith.constant 0 : i32
    %c0_i32_0 = arith.constant 0 : i32
    return %arg0, %c0_i32, %arg1 : i32, i32, i32
  }
  func.func @transform_1(%arg0: i32, %arg1: i32) -> (i32, i32, i32, i32) {
    %c0_i32 = arith.constant 0 : i32
    %c0_i32_0 = arith.constant 0 : i32
    %c0_i32_1 = arith.constant 0 : i32
    return %arg0, %arg1, %c0_i32, %c0_i32_0 : i32, i32, i32, i32
  }
  func.func @transform_2(%arg0: i32, %arg1: i32) -> (i32, i32) {
    %c0_i32 = arith.constant 0 : i32
    %c0_i32_0 = arith.constant 0 : i32
    %c0_i32_1 = arith.constant 0 : i32
    return %c0_i32, %c0_i32_0 : i32, i32
  }
  func.func @transform_3(%arg0: i32, %arg1: i32) -> (i32, i32) {
    %c0_i32 = arith.constant 0 : i32
    %c0_i32_0 = arith.constant 0 : i32
    %c0_i32_1 = arith.constant 0 : i32
    return %c0_i32, %c0_i32_0 : i32, i32
  }
  func.func @transform_4(%arg0: i32, %arg1: i32) -> (i32, i32) {
    %c0_i32 = arith.constant 0 : i32
    %c0_i32_0 = arith.constant 0 : i32
    %c0_i32_1 = arith.constant 0 : i32
    return %c0_i32, %c0_i32_0 : i32, i32
  }
  func.func @transform_5(%arg0: i32, %arg1: i32) -> (i32, i32) {
    %c0_i32 = arith.constant 0 : i32
    %c0_i32_0 = arith.constant 0 : i32
    %c0_i32_1 = arith.constant 0 : i32
    return %c0_i32, %c0_i32_0 : i32, i32
  }
  func.func @transform_6(%arg0: i32, %arg1: i32) -> (i32, i32) {
    %c0_i32 = arith.constant 0 : i32
    %c0_i32_0 = arith.constant 0 : i32
    %c0_i32_1 = arith.constant 0 : i32
    return %c0_i32, %c0_i32_0 : i32, i32
  }
  func.func @transform_7(%arg0: i32, %arg1: i32) -> (i32, i32, i32) {
    %c0_i32 = arith.constant 0 : i32
    %c0_i32_0 = arith.constant 0 : i32
    return %arg0, %c0_i32, %arg1 : i32, i32, i32
  }
}

</mosaic_0001>

<bundles_post_ra>
// kernel: tpu_custom_call.1
= control target key start
LH: loop header
LB: loop body
LE: loop exit
PB: predicated region body
PF: predicated region fallthrough
CT: control target
= control target key end

     0   :  { %s1479_s0 = inlined_call_operand.vmem [shape: bf16[2,16,256], index: 0, kind: input, shape index: {}]   ;;  %s1480_s1 = inlined_call_operand.vmem [shape: bf16[2,2,16,8], index: 1, kind: input, shape index: {}]   ;;  %s1481_s2 = inlined_call_operand.vmem [shape: bf16[64,48], index: 2, kind: input, shape index: {}]   ;;  %s1482_s3 = inlined_call_operand.vmem [shape: f32[32,1], index: 3, kind: input, shape index: {}]   ;;  %s1483_s4 = inlined_call_operand.vmem [shape: bf16[32,96], index: 4, kind: input, shape index: {}]   ;;  %s1484_s5 = inlined_call_operand.vmem [shape: f32[32,1], index: 5, kind: input, shape index: {}]   ;;  %s1485_s6 = inlined_call_operand.vmem [shape: f32[32,1], index: 6, kind: input, shape index: {}]   ;;  %s1486_s7 = inlined_call_operand.hbm [shape: f32[2,32,256], index: 7, kind: output, shape index: {}]  }
   0x1   :  { %1489 = sst [smem:[#allocation8_spill]] %s1479_s0 }
   0x2   :  { %12 = vsyncpa [#allocation4], 0 }
   0x3   :  { %14 = vsyncpa [#allocation4 + $0x1], 0  ;;  %s1211_s24 = smov 0   ;;  %s1213_s25 = smov 0  }
   0x4   :  { %s1215_s26 = smov 0   ;;  %s1217_s27 = smov 0  }
   0x5   :  { %s1219_s28 = smov 0   ;;  %s1221_s29 = smov 0  }
   0x6   :  { %s1223_s30 = smov 0   ;;  %s1225_s8 = smov 0  }
   0x7 LB: > { %s916_s9 = sadd.s32 4294967295, %s1162_s8   ;;  %s917_s10 = sadd.s32 4294967294, %s1162_s8   ;;  %s1162_s8 = sphi %s1225_s8, %s20_s8   ;;  %s1158_s30 = sphi %s1223_s30, %s1506_s30   ;;  %s1154_s29 = sphi %s1221_s29, %s1505_s29   ;;  %s1150_s28 = sphi %s1219_s28, %s1504_s28   ;;  %s1146_s27 = sphi %s1217_s27, %s1503_s27   ;;  %s1142_s26 = sphi %s1215_s26, %s1502_s26   ;;  %s1138_s25 = sphi %s1213_s25, %s1501_s25   ;;  %s1134_s24 = sphi %s1211_s24, %s1500_s24  }
   0x8   : > { %s29_s11 = sadd.s32 1, %s1154_s29  ;;  %s32_s12 = sadd.s32 1, %s1158_s30 }
   0x9   : > { %p30_p0 = scmp.ge.s32.totalorder %s29_s11, 2  ;;  %p48_p1 = scmp.ne.s32.totalorder %s1142_s26, %s1138_s25 }
   0xa   : > { %p49_p2 = scmp.eq.s32.totalorder %s1162_s8, 0  ;;  %p213_p5 = scmp.eq.s32.totalorder %s916_s9, 3 }
   0xb   : > { %s1508_s11 = smov (%p30_p0, %s29_s11), 0  ;;  %s1510_s12 = smov (!%p30_p0, %s32_s12), %s1158_s30 }
   0xc   : > { %1490 = sst [smem:[#allocation6_spill]] %s1508_s11  ;;  %s37_s13 = ssub.s32 %s1154_s29, %s1508_s11 }
   0xd   : > { %p1263_p3 = por %p49_p2, %p48_p1  ;;  %p34_p4 = scmp.ge.s32.totalorder %s1510_s12, 2 }
   0xe   : > { %p218_p6 = scmp.ne.s32.totalorder %s1138_s25, %s1134_s24  ;;  %p219_p7 = scmp.eq.s32.totalorder %s917_s10, 3 }
   0xf   : > { %s1512_s12 = smov (%p34_p4, %s1510_s12), 0  ;;  %p1271_p8 = por %p213_p5, %p48_p1 }
  0x10   : > { %1492 = sst [smem:[#allocation7_spill]] %s1512_s12  ;;  %p1275_p9 = por %p219_p7, %p218_p6 }
  0x11   : > { %s36_s17 = ssub.s32 %s1158_s30, %s1512_s12  ;;  %s41_s19 = sadd.s32 1, %s1142_s26 }
  0x12   : > { %s38_s18 = sor.u32 %s37_s13, %s36_s17  ;;  %p919_p11 = scmp.ge.s32.totalorder %s1162_s8, 4 }
  0x13   : > { %p39_p10 = scmp.eq.s32.totalorder %s38_s18, 0 }
  0x14   : > { %250 = sbr.rel (%p919_p11) target bundleno = 36 (0x24), region = 36 }
  0x15   : > { %s1283_s20 = scalar_select %p39_p10, %s1142_s26, %s41_s19  }
  0x19   : > { %253 = sbr.rel (!%p1263_p3) target bundleno = 36 (0x24), region = 40  ;;  %s255_s21 = sand.u32 (%p1263_p3), 1, %s1142_s26  }
  0x1a   : > { %s921_s22 = sshll.u32 (%p1263_p3), %s1158_s30, 2  ;;  %s920_s23 = sshll.u32 (%p1263_p3), %s255_s21, 3 }
  0x1b   : > { %s259_s9 = sadd.s32 (%p1263_p3), %s1154_s29, %s921_s22  ;;  %s1495_s0 = sld [smem:[#allocation8_spill]] (%p1263_p3) }
  0x1c   : > { %s922_s10 = sshll.u32 (%p1263_p3), %s259_s9, 2  ;;  %s257_s18 = scalar_lea.vmem (%p1263_p3), [#allocation2], %s920_s23 }
  0x21   : > { %s261_s17 = scalar_lea.vmem %s1495_s0, %s922_s10 }
  0x22   : > { %v278_v0 = vld [vmem:[%s261_s17] sm:$0xf]  ;;  %v280_v1 = vld [vmem:[%s261_s17 + $0x8] sm:$0xf] }
  0x23   : > { %279 = vst [vmem:[%s257_s18] sm:$0xf] %v278_v0  ;;  %281 = vst [vmem:[%s257_s18 + $0x4] sm:$0xf] %v280_v1 }
  0x24 PF: > { %p923_p12 = scmp.ge.s32.totalorder %s1162_s8, 1  ;;  %p320_p13 = scmp.lt.s32.totalorder %s1162_s8, 5 }
  0x26   : > { %p321_p0 = pnand %p923_p12, %p320_p13 }
  0x27   : > { %s1297_s12 = sand.u32 (!%p321_p0), 1, %s1138_s25   ;;  %s1164_s21 = smov (!%p321_p0), 8  }
  0x28   : > { %324 = sbr.rel (%p321_p0) target bundleno = 865 (0x361), region = 85  ;;  %s924_s14 = sshll.u32 (!%p321_p0), %s1297_s12, 3 }
  0x29   : > { %s329_s19 = scalar_lea.vmem (!%p321_p0), [#allocation2], %s924_s14  ;;  %p367_p1 = scmp.lt.s32.totalorder (!%p321_p0), %s1150_s28, 1 }
  0x2a   : > { %p369_p2 = scmp.lt.s32.totalorder (!%p321_p0), %s1146_s27, 1  ;;  %s1166_s14 = smov (!%p321_p0), 124  }
  0x2d   : > { %v1062_v2 = vld [vmem:[%s329_s19] sm:$0xff]   ;;  %s368_s22 = scalar_select %p367_p1, %s1150_s28, 1  ;;  %vm394_vm0 = vcmask 64512   ;;  %v1165_v4 = vmov 0   ;;  %v532_v7 = vld [vmem:[%s1482_s3 + $0x10] sm:$0xff]  ;;  %v533_v8 = vld [vmem:[%s1482_s3 + $0x18] sm:$0xff]  ;;  %v571_v29 = vlaneseq }
  0x2e   : > { %391 = vrot.lane.b32.xlu0 %v1062_v2, %s1164_s21  ;;  %s370_s23 = scalar_select %p369_p2, %s1146_s27, 1  ;;  %489 = vmatprep.mubr.bf16.mxu0 %v1165_v4  ;;  %v530_v9 = vld [vmem:[%s1482_s3] sm:$0xff]  ;;  %v531_v10 = vld [vmem:[%s1482_s3 + $0x8] sm:$0xff]  ;;  %vm412_vm1 = vcmask 1014784   ;;  %vm404_vm2 = vcmask 1031168   ;;  %vm444_vm3 = vcmask 392192  }
  0x2f   : > { %s927_s9 = sshll.u32 %s368_s22, 2  ;;  %1060 = vset.pattern.permute.xlu1 %v1165_v4  ;;  %1061 = vset.pattern.permute.xlu0 %v1165_v4  ;;  %s1167_s19 = smov 126   ;;  %v1064_v17 = vld [vmem:[%s1481_s2] sm:$0xff]   ;;  %v1065_v18 = vld [vmem:[%s1481_s2 + $0x8] sm:$0xff]   ;;  %v1066_v19 = vld [vmem:[%s1481_s2 + $0x10] sm:$0xff]   ;;  %v572_v36 = vand.u32 127, %v571_v29 }
  0x30   : > { %s926_s10 = sshll.u32 %s370_s23, 1  ;;  %v1067_v20 = vld [vmem:[%s1481_s2 + $0x18] sm:$0xff]   ;;  %vm660_vm6 = vcmask 785408   ;;  %s925_s22 = sshll.u32 %s1297_s12, 5 }
  0x31   : > { %s373_s13 = sadd.s32 %s927_s9, %s926_s10  ;;  %v573_v45 = vadd.s32 128, %v572_v36 }
  0x32   : > { %s928_s17 = sshll.u32 %s373_s13, 2  ;;  %s798_s13 = scalar_lea.sflag [#allocation4], %s1297_s12 }
  0x33   : > { %s375_s11 = scalar_lea.vmem %s1480_s1, %s928_s17  ;;  %s939_s17 = sshll.u32 %s1146_s27, 7 }
  0x34   : > { %v1063_v3 = vld [vmem:[%s375_s11] sm:$0xff]   ;;  %s574_s18 = ssub.s32 4, %s939_s17  ;;  %s955_s11 = sshll.u32 %s1150_s28, 3 }
  0x35   : > { %v575_v42 = vstv %s574_s18  ;;  %s1168_s18 = smov [#allocation3]  }
  0x36   : > { %vm1341_vm4 = vcmp.lt.s32.totalorder %v572_v36, %v575_v42  ;;  %vm577_vm5 = vcmp.lt.s32.totalorder %v573_v45, %v575_v42  ;;  %s1074_s0 = sshll.u32 %s1168_s18, 4  ;;  %s1075_s0 = int_to_ptr.vmem [resolvable:$false] %s1074_s0 }
  0x37   : > { %vm942_vm7 = vmneg %vm1341_vm4 }
  0x38   : > { %vm944_vm8 = vmpackc.low %vm942_vm7, %vm942_vm7 }
  0xa0   : > { %v392_v5 = vpop.permute.xlu0 %391 }
  0xa1   : > { %410 = vrot.lane.b32.xlu1 %v392_v5, %s1166_s14  ;;  %v397_v6 = vsel %vm394_vm0, %v1063_v3, %v392_v5 }
  0xa2   : > { %408 = vrot.lane.b32.xlu0 %v397_v6, %s1166_s14 }
  0xa5   : > { %400 = vrot.lane.b32.xlu1 %v397_v6, %s1167_s19 }
  0xa6   : > { %402 = vrot.lane.b32.xlu0 %v392_v5, %s1167_s19 }
  0xa9   : > { %546 = vperm.xlu1 %1060, %v532_v7   ;;  %v722_v7 = vld [vmem:[%s1485_s6 + $0x10] sm:$0xff] }
  0xaa   : > { %551 = vperm.xlu0 %1061, %v533_v8   ;;  %v723_v8 = vld [vmem:[%s1485_s6 + $0x18] sm:$0xff] }
  0xad   : > { %536 = vperm.xlu1 %1060, %v530_v9   ;;  %v626_v9 = vld [vmem:[%s1484_s5] sm:$0xff] }
  0xb1   : > { %541 = vperm.xlu1 %1060, %v531_v10   ;;  %v627_v10 = vld [vmem:[%s1484_s5 + $0x8] sm:$0xff] }
 0x113   : > { %v411_v11 = vpop.permute.xlu1 %410 }
 0x114   : > { %v409_v12 = vpop.permute.xlu0 %408  ;;  %467 = vmatprep.subr.bf16.mxu0 %v411_v11 }
 0x115   : > { %v413_v13 = vsel %vm412_vm1, %v409_v12, %v411_v11  ;;  %v628_v11 = vld [vmem:[%s1484_s5 + $0x10] sm:$0xff]  ;;  %v629_v12 = vld [vmem:[%s1484_s5 + $0x18] sm:$0xff] }
 0x116   : > { %468 = vmatpush1.bf16.msra.mxu0 %v413_v13 }
 0x117   : > { %v401_v14 = vpop.permute.xlu1 %400 }
 0x118   : > { %v403_v15 = vpop.permute.xlu0 %402 }
 0x119   : > { %469 = vmatprep.subr.bf16.mxu0 %v403_v15  ;;  %v405_v16 = vsel %vm404_vm2, %v401_v14, %v403_v15 }
 0x11a   : > { %470 = vmatpush1.bf16.msra.mxu0 %v405_v16 }
 0x11b   : > { %471 = vmatprep.subr.bf16.mxu0 %v392_v5  ;;  %v720_v5 = vld [vmem:[%s1485_s6] sm:$0xff] }
 0x11e   : > { %472 = vmatpush1.bf16.msra.mxu0 %v397_v6  ;;  %v721_v6 = vld [vmem:[%s1485_s6 + $0x8] sm:$0xff] }
 0x121   : > { %935 = vmatmul.mubr.msk.bf16.vlgmr.msra.gmra.mxu0 %vm444_vm3, %v1064_v17 }
 0x122   : > { %499 = vmatprep.mubr.bf16.mxu0 %v1165_v4 }
 0x124   : > { %v547_v21 = vpop.permute.xlu1 %546 }
 0x125   : > { %v552_v38 = vpop.permute.xlu0 %551 }
 0x128   : > { %v537_v22 = vpop.permute.xlu1 %536 }
 0x129   : > { %936 = vmatmul.mubr.msk.bf16.gmra.mxu0 %vm444_vm3, %v1065_v18 }
 0x12a   : > { %509 = vmatprep.mubr.bf16.mxu0 %v1165_v4 }
 0x12c   : > { %v542_v25 = vpop.permute.xlu1 %541 }
 0x131   : > { %937 = vmatmul.mubr.msk.bf16.gmra.mxu0 %vm444_vm3, %v1066_v19 }
 0x132   : > { %519 = vmatprep.mubr.bf16.mxu0 %v1165_v4  ;;  %v1068_v4 = vld [vmem:[%s1483_s4] sm:$0xff]  }
 0x133   : > { %979 = vmatprep.mubr.msk.bf16.mxu1 %vm660_vm6, %v1068_v4 }
 0x139   : > { %938 = vmatmul.mubr.msk.bf16.gmra.mxu0 %vm444_vm3, %v1067_v20 }
 0x1e1   : > { %v491_v23 = vpop.f32.mrf.mxu0 }
 0x1e2   : > { %v554_v26 = vadd.f32 %v537_v22, %v491_v23 }
 0x1e3   : > { %v493_v24 = vpop.f32.mrf.mxu0 }
 0x1e4   : > { %v562_v31 = vmax.f32 %v554_v26, 0.0  ;;  %v555_v47 = vadd.f32 %v537_v22, %v493_v24 }
 0x1e5   : > { %v495_v27 = vpop.f32.mrf.mxu0 }
 0x1e6   : > { %v556_v28 = vadd.f32 %v542_v25, %v495_v27  ;;  %v563_v58 = vmax.f32 %v555_v47, 0.0  ;;  %v582_v63 = vsel %vm1341_vm4, 0.0, %v562_v31 }
 0x1e7   : > { %v497_v30 = vpop.f32.mrf.mxu0 }
 0x1e8   : > { %v564_v32 = vmax.f32 %v556_v28, 0.0  ;;  %v557_v40 = vadd.f32 %v542_v25, %v497_v30  ;;  %v583_v2 = vsel %vm577_vm5, 0.0, %v563_v58 }
 0x1e9   : > { %v501_v33 = vpop.f32.mrf.mxu0 }
 0x1ea   : > { %v1339_v34 = vpack.c.bf16 %v564_v32, %v562_v31  ;;  %v558_v35 = vadd.f32 %v547_v21, %v501_v33  ;;  %v565_v52 = vmax.f32 %v557_v40, 0.0  ;;  %v584_v59 = vsel %vm1341_vm4, 0.0, %v564_v32  ;;  %v1069_v31 = vld [vmem:[%s1483_s4 + $0x8] sm:$0xff]  }
 0x1eb   : > { %v503_v37 = vpop.f32.mrf.mxu0  ;;  %v590_v1 = vpack.c.bf16 %v584_v59, %v582_v63 }
 0x1ec   : > { %v559_v39 = vadd.f32 %v547_v21, %v503_v37  ;;  %v566_v43 = vmax.f32 %v558_v35, 0.0  ;;  %v585_v0 = vsel %vm577_vm5, 0.0, %v565_v52 }
 0x1ed   : > { %v505_v41 = vpop.f32.mrf.mxu0  ;;  %v591_v3 = vpack.c.bf16 %v585_v0, %v583_v2 }
 0x1ee   : > { %v560_v44 = vadd.f32 %v552_v38, %v505_v41  ;;  %v567_v48 = vmax.f32 %v559_v39, 0.0  ;;  %v586_v53 = vsel %vm1341_vm4, 0.0, %v566_v43 }
 0x1ef   : > { %v507_v46 = vpop.f32.mrf.mxu0 }
 0x1f0   : > { %v568_v49 = vmax.f32 %v560_v44, 0.0  ;;  %v561_v50 = vadd.f32 %v552_v38, %v507_v46  ;;  %v587_v60 = vsel %vm577_vm5, 0.0, %v567_v48 }
 0x1f1   : > { %v511_v19 = vpop.f32.mrf.mxu0 }
 0x1f2   : > { %v588_v54 = vsel %vm1341_vm4, 0.0, %v568_v49  ;;  %v1349_v55 = vpack.c.bf16 %v568_v49, %v566_v43  ;;  %v569_v56 = vmax.f32 %v561_v50, 0.0 }
 0x1f3   : > { %v592_v57 = vpack.c.bf16 %v588_v54, %v586_v53  ;;  %v513_v23 = vpop.f32.mrf.mxu0 }
 0x1f4   : > { %v589_v61 = vsel %vm577_vm5, 0.0, %v569_v56 }
 0x1f5   : > { %614 = vrot.lane.b32.xlu0 %v592_v57, %s1166_s14  ;;  %v593_v62 = vpack.c.bf16 %v589_v61, %v587_v60  ;;  %v515_v27 = vpop.f32.mrf.mxu0 }
 0x1f7   : > { %616 = vrot.lane.b32.xlu1 %v593_v62, %s1166_s14  ;;  %v517_v28 = vpop.f32.mrf.mxu0 }
 0x1f9   : > { %610 = vrot.lane.b32.xlu0 %v590_v1, %s1166_s14  ;;  %v521_v29 = vpop.f32.mrf.mxu0 }
 0x1fb   : > { %612 = vrot.lane.b32.xlu1 %v591_v3, %s1166_s14  ;;  %v523_v35 = vpop.f32.mrf.mxu0 }
 0x1fd   : > { %602 = vrot.lane.b32.xlu0 %v592_v57, %s1167_s19  ;;  %v525_v39 = vpop.f32.mrf.mxu0 }
 0x1ff   : > { %604 = vrot.lane.b32.xlu1 %v593_v62, %s1167_s19  ;;  %v527_v42 = vpop.f32.mrf.mxu0 }
 0x201   : > { %598 = vrot.lane.b32.xlu0 %v590_v1, %s1167_s19 }
 0x203   : > { %600 = vrot.lane.b32.xlu1 %v591_v3, %s1167_s19  ;;  %s366_s19 = scalar_lea.vmem [#allocation3], %s925_s22  ;;  %s1076_s22 = scalar_lea.vmem %s1075_s0, 1024 }
 0x204   : > { %s812_s28 = sshll.u32 %s366_s19, 4  ;;  %s1420_s28 = int_to_ptr.vmem [resolvable:$true] %s812_s28 }
 0x205   : > { %726 = vperm.xlu0 %1061, %v720_v5   ;;  %s1070_s17 = scalar_lea.vmem %s1420_s28, 512  ;;  %p1077_p6 = scmp.lt.s32.totalorder %s1420_s28, %s1075_s0 }
 0x206   : > { %p1071_p3 = scmp.ne.s32.totalorder %s1420_s28, %s1070_s17  ;;  %p1078_p7 = scmp.lt.s32.totalorder %s1076_s22, %s1070_s17 }
 0x207   : > { %731 = vperm.xlu1 %1060, %v721_v6  }
 0x208   : > { %p1072_p4 = pnand %p1071_p3, %p1271_p8  ;;  %p1079_p10 = por %p1078_p7, %p1077_p6 }
 0x209   : > { %736 = vperm.xlu0 %1061, %v722_v7  }
 0x20a   : > { %p1073_p5 = pneg %p1072_p4 }
 0x20b   : > { %741 = vperm.xlu1 %1060, %v723_v8  }
 0x20c   : > { %p1080_p11 = pnand %p1079_p10, %p1073_p5 }
 0x20d   : > { %632 = vperm.xlu0 %1061, %v626_v9  }
 0x20f   : > { %637 = vperm.xlu1 %1060, %v627_v10  }
 0x211   : > { %642 = vperm.xlu0 %1061, %v628_v11  }
 0x213   : > { %647 = vperm.xlu1 %1060, %v629_v12  }
 0x267   : > { %v615_v13 = vpop.permute.xlu0 %614 }
 0x269   : > { %v617_v14 = vpop.permute.xlu1 %616 }
 0x26a   : > { %v619_v15 = vsel %vm412_vm1, %v615_v13, %v617_v14 }
 0x26b   : > { %v611_v16 = vpop.permute.xlu0 %610  ;;  %967 = vmatprep.subr.bf16.mxu1 %v619_v15 }
 0x26c   : > { %968 = vmatpush3.bf16.msra.mxu1 %v619_v15 }
 0x26d   : > { %v613_v17 = vpop.permute.xlu1 %612 }
 0x26e   : > { %v618_v18 = vsel %vm412_vm1, %v611_v16, %v613_v17 }
 0x26f   : > { %v603_v20 = vpop.permute.xlu0 %602  ;;  %969 = vmatprep.subr.bf16.mxu1 %v618_v18 }
 0x270   : > { %970 = vmatpush3.bf16.msra.mxu1 %v618_v18 }
 0x271   : > { %v605_v21 = vpop.permute.xlu1 %604 }
 0x272   : > { %v607_v22 = vsel %vm404_vm2, %v603_v20, %v605_v21 }
 0x273   : > { %971 = vmatprep.subr.bf16.mxu1 %v607_v22  ;;  %v599_v24 = vpop.permute.xlu0 %598 }
 0x274   : > { %972 = vmatpush3.bf16.msra.mxu1 %v607_v22 }
 0x275   : > { %v601_v25 = vpop.permute.xlu1 %600 }
 0x276   : > { %v606_v26 = vsel %vm404_vm2, %v599_v24, %v601_v25 }
 0x277   : > { %973 = vmatprep.subr.bf16.mxu1 %v606_v26 }
 0x278   : > { %974 = vmatpush3.bf16.msra.mxu1 %v606_v26 }
 0x279   : > { %975 = vmatprep.subr.msk.bf16.mxu1 %vm944_vm8, %v1349_v55 }
 0x27c   : > { %976 = vmatpush3.bf16.msk.msra.mxu1 %vm944_vm8, %v1349_v55 }
 0x27d   : > { %977 = vmatprep.subr.msk.bf16.mxu1 %vm944_vm8, %v1339_v34 }
 0x280   : > { %v727_v30 = vpop.permute.xlu0 %726  ;;  %978 = vmatpush3.bf16.msk.msra.mxu1 %vm944_vm8, %v1339_v34 }
 0x281   : > { %v744_v32 = vadd.f32 %v727_v30, %v511_v19  ;;  %v745_v33 = vadd.f32 %v727_v30, %v513_v23 }
 0x282   : > { %v732_v36 = vpop.permute.xlu1 %731 }
 0x283   : > { %762 = vrot.lane.b32.xlu1 %v745_v33, %s1166_s14  ;;  %760 = vrot.lane.b32.xlu0 %v744_v32, %s1166_s14  ;;  %v746_v37 = vadd.f32 %v732_v36, %v515_v27  ;;  %v747_v38 = vadd.f32 %v732_v36, %v517_v28 }
 0x284   : > { %980 = vmatmul.mubr.msk.bf16.vlgmr.msra.gmra.mxu1 %vm660_vm6, %v1069_v31  ;;  %v737_v40 = vpop.permute.xlu0 %736 }
 0x285   : > { %v748_v34 = vadd.f32 %v737_v40, %v521_v29  ;;  %v749_v41 = vadd.f32 %v737_v40, %v523_v35 }
 0x286   : > { %v742_v43 = vpop.permute.xlu1 %741 }
 0x287   : > { %766 = vrot.lane.b32.xlu1 %v747_v38, %s1166_s14  ;;  %764 = vrot.lane.b32.xlu0 %v746_v37, %s1166_s14  ;;  %v750_v44 = vadd.f32 %v742_v43, %v525_v39  ;;  %v751_v45 = vadd.f32 %v742_v43, %v527_v42 }
 0x288   : > { %v633_v46 = vpop.permute.xlu0 %632 }
 0x28a   : > { %v638_v47 = vpop.permute.xlu1 %637 }
 0x28b   : > { %770 = vrot.lane.b32.xlu1 %v749_v41, %s1166_s14  ;;  %768 = vrot.lane.b32.xlu0 %v748_v34, %s1166_s14 }
 0x28c   : > { %v643_v48 = vpop.permute.xlu0 %642 }
 0x28e   : > { %v648_v49 = vpop.permute.xlu1 %647 }
 0x28f   : > { %774 = vrot.lane.b32.xlu1 %v751_v45, %s1166_s14  ;;  %772 = vrot.lane.b32.xlu0 %v750_v44, %s1166_s14  ;;  %s809_s14 = sadd.s32 %s1146_s27, %s955_s11 }
 0x290   : > { %s956_s23 = sshll.u32 %s809_s14, 7 }
 0x291   : > { %s1425_s10 = scalar_lea.hbm %s1486_s7, %s956_s23 }
 0x2f5   : > { %v761_v50 = vpop.permute.xlu0 %760  ;;  %v763_v51 = vpop.permute.xlu1 %762 }
 0x2f6   : > { %v777_v4 = vsel %vm412_vm1, %v761_v50, %v763_v51 }
 0x2f9   : > { %v765_v52 = vpop.permute.xlu0 %764  ;;  %v767_v53 = vpop.permute.xlu1 %766 }
 0x2fa   : > { %v778_v14 = vsel %vm412_vm1, %v765_v52, %v767_v53 }
 0x2fd   : > { %v769_v54 = vpop.permute.xlu0 %768  ;;  %v771_v55 = vpop.permute.xlu1 %770 }
 0x2fe   : > { %v779_v61 = vsel %vm412_vm1, %v769_v54, %v771_v55 }
 0x301   : > { %v773_v63 = vpop.permute.xlu0 %772  ;;  %v775_v0 = vpop.permute.xlu1 %774 }
 0x302   : > { %v780_v10 = vsel %vm412_vm1, %v773_v63, %v775_v0 }
 0x344   : > { %v981_v56 = vpop.f32.mrf.mxu1 }
 0x345   : > { %v710_v57 = vadd.f32 %v981_v56, %v643_v48 }
 0x346   : > { %v701_v58 = vpop.f32.mrf.mxu1 }
 0x347   : > { %v718_v59 = vmax.f32 %v710_v57, 0.0  ;;  %v702_v60 = vadd.f32 %v701_v58, %v633_v46 }
 0x348   : > { %v982_v62 = vpop.f32.mrf.mxu1 }
 0x349   : > { %v787_v1 = vadd.f32 %v779_v61, %v718_v59  ;;  %v716_v2 = vmax.f32 %v702_v60, 0.0  ;;  %v713_v3 = vadd.f32 %v982_v62, %v648_v49 }
 0x34a   : > { %v704_v5 = vpop.f32.mrf.mxu1 }
 0x34b   : > { %v791_v6 = vmax.f32 %v787_v1, 0.0  ;;  %v785_v7 = vadd.f32 %v777_v4, %v716_v2  ;;  %v719_v8 = vmax.f32 %v713_v3, 0.0  ;;  %v705_v9 = vadd.f32 %v704_v5, %v638_v47 }
 0x34d   : > { %795 = vst [vmem:[%s366_s19 + $0x10] sm:$0xff] %v791_v6  ;;  %v789_v11 = vmax.f32 %v785_v7, 0.0  ;;  %v788_v12 = vadd.f32 %v780_v10, %v719_v8  ;;  %v717_v13 = vmax.f32 %v705_v9, 0.0 }
 0x34f   : > { %793 = vst [vmem:[%s366_s19] sm:$0xff] %v789_v11  ;;  %v792_v15 = vmax.f32 %v788_v12, 0.0  ;;  %v786_v16 = vadd.f32 %v778_v14, %v717_v13 }
 0x351   : > { %796 = vst [vmem:[%s366_s19 + $0x18] sm:$0xff] %v792_v15  ;;  %v790_v17 = vmax.f32 %v786_v16, 0.0 }
 0x353   : > { %794 = vst [vmem:[%s366_s19 + $0x8] sm:$0xff] %v790_v17 }
 0x354   : > { %1083 = shalt.err (!%p1080_p11)
}
 0x355   : > { %s1084_s11 = scalar_lea.hbm %s1425_s10, 512  ;;  %s1088_s23 = scalar_lea.hbm %s1486_s7, 2048 }
 0x356   : > { %p1085_p12 = scmp.ne.s32.totalorder %s1425_s10, %s1084_s11  ;;  %p1089_p1 = scmp.lt.s32.totalorder %s1425_s10, %s1486_s7 }
 0x357   : > { %p1090_p2 = scmp.lt.s32.totalorder %s1088_s23, %s1084_s11 }
 0x358   : > { %p1086_p13 = pnand %p1085_p12, %p1271_p8 }
 0x359   : > { %p1091_p3 = por %p1090_p2, %p1089_p1 }
 0x35a   : > { %p1087_p0 = pneg %p1086_p13 }
 0x35c   : > { %p1092_p4 = pnand %p1091_p3, %p1087_p0 }
 0x35e   : > { %1095 = shalt.err (!%p1092_p4)
}
 0x35f   : > { %s1169_s17 = smov 128   ;;  %s1170_s18 = smov 256  }
 0x360   : > { %983 = dma.vmem_to_hbm [thread:$0]  (%p1271_p8), %s1420_s28, 512, %s1425_s10, %s798_s13, %s1169_s17, %s1170_s18, %s1164_s21  }
 0x361 PF: > { %p989_p5 = scmp.ge.s32.totalorder %s1162_s8, 2  ;;  %s827_s0 = sand.u32 1, %s1134_s24  }
 0x362   : > { %s828_s22 = scalar_lea.sflag [#allocation4], %s827_s0 }
 0x363   : > { %p986_p6 = pnand %p989_p5, %p1275_p9 }
 0x365   : > { %p987_p7 = pneg %p986_p6 }
 0x367   : > { %1129 = dma.done.wait (%p987_p7), %s828_s22, 512  }
 0x368   : > { %1131 = vsyncadd (%p987_p7), %s828_s22, 4294966784  ;;  %s20_s8 = sadd.s32 1, %s1162_s8   ;;  %s1498_s15 = sld [smem:[#allocation6_spill]] }
 0x369   : > { %p17_p10 = scmp.ge.s32.totalorder %s20_s8, 6   ;;  %s1499_s12 = sld [smem:[#allocation7_spill]] }
 0x36a   : > { %s1500_s24 = smov %s1138_s25  ;;  %s1501_s25 = smov %s1142_s26 }
 0x36b   : > { %s1502_s26 = smov %s1283_s20  ;;  %s1503_s27 = smov %s1154_s29 }
 0x36c   : > { %s1504_s28 = smov %s1158_s30  ;;  %19 = sbr.rel (!%p17_p10) target bundleno = 7 (0x7), region = 132 }
 0x36e   : > { %s1505_s29 = smov %s1498_s15 }
 0x36f   : > { %s1506_s30 = smov %s1499_s12 }
 0x371   :  { %833 = vsyncpa [#allocation4], 1 }
 0x372   :  { %835 = vsyncpa [#allocation4 + $0x1], 1 }

// kernel: tpu_custom_call.1
= control target key start
LH: loop header
LB: loop body
LE: loop exit
PB: predicated region body
PF: predicated region fallthrough
CT: control target
= control target key end

     0   :  { %s1479_s0 = inlined_call_operand.vmem [shape: bf16[2,16,256], index: 0, kind: input, shape index: {}]   ;;  %s1480_s1 = inlined_call_operand.vmem [shape: bf16[2,2,16,8], index: 1, kind: input, shape index: {}]   ;;  %s1481_s2 = inlined_call_operand.vmem [shape: bf16[64,48], index: 2, kind: input, shape index: {}]   ;;  %s1482_s3 = inlined_call_operand.vmem [shape: f32[32,1], index: 3, kind: input, shape index: {}]   ;;  %s1483_s4 = inlined_call_operand.vmem [shape: bf16[32,96], index: 4, kind: input, shape index: {}]   ;;  %s1484_s5 = inlined_call_operand.vmem [shape: f32[32,1], index: 5, kind: input, shape index: {}]   ;;  %s1485_s6 = inlined_call_operand.vmem [shape: f32[32,1], index: 6, kind: input, shape index: {}]   ;;  %s1486_s7 = inlined_call_operand.hbm [shape: f32[2,32,256], index: 7, kind: output, shape index: {}]  }
   0x1   :  { %1489 = sst [smem:[#allocation8_spill]] %s1479_s0 }
   0x2   :  { %12 = vsyncpa [#allocation4], 0 }
   0x3   :  { %14 = vsyncpa [#allocation4 + $0x1], 0  ;;  %s1211_s24 = smov 0   ;;  %s1213_s25 = smov 0  }
   0x4   :  { %s1215_s26 = smov 0   ;;  %s1217_s27 = smov 0  }
   0x5   :  { %s1219_s28 = smov 0   ;;  %s1221_s29 = smov 0  }
   0x6   :  { %s1223_s30 = smov 0   ;;  %s1225_s8 = smov 0  }
   0x7 LB: > { %s916_s9 = sadd.s32 4294967295, %s1162_s8   ;;  %s917_s10 = sadd.s32 4294967294, %s1162_s8   ;;  %s1162_s8 = sphi %s1225_s8, %s20_s8   ;;  %s1158_s30 = sphi %s1223_s30, %s1506_s30   ;;  %s1154_s29 = sphi %s1221_s29, %s1505_s29   ;;  %s1150_s28 = sphi %s1219_s28, %s1504_s28   ;;  %s1146_s27 = sphi %s1217_s27, %s1503_s27   ;;  %s1142_s26 = sphi %s1215_s26, %s1502_s26   ;;  %s1138_s25 = sphi %s1213_s25, %s1501_s25   ;;  %s1134_s24 = sphi %s1211_s24, %s1500_s24  }
   0x8   : > { %s29_s11 = sadd.s32 1, %s1154_s29  ;;  %s32_s12 = sadd.s32 1, %s1158_s30 }
   0x9   : > { %p30_p0 = scmp.ge.s32.totalorder %s29_s11, 2  ;;  %p48_p1 = scmp.ne.s32.totalorder %s1142_s26, %s1138_s25 }
   0xa   : > { %p49_p2 = scmp.eq.s32.totalorder %s1162_s8, 0  ;;  %p213_p5 = scmp.eq.s32.totalorder %s916_s9, 3 }
   0xb   : > { %s1508_s11 = smov (%p30_p0, %s29_s11), 0  ;;  %s1510_s12 = smov (!%p30_p0, %s32_s12), %s1158_s30 }
   0xc   : > { %1490 = sst [smem:[#allocation6_spill]] %s1508_s11  ;;  %s37_s13 = ssub.s32 %s1154_s29, %s1508_s11 }
   0xd   : > { %p1263_p3 = por %p49_p2, %p48_p1  ;;  %p34_p4 = scmp.ge.s32.totalorder %s1510_s12, 2 }
   0xe   : > { %p218_p6 = scmp.ne.s32.totalorder %s1138_s25, %s1134_s24  ;;  %p219_p7 = scmp.eq.s32.totalorder %s917_s10, 3 }
   0xf   : > { %s1512_s12 = smov (%p34_p4, %s1510_s12), 0  ;;  %p1271_p8 = por %p213_p5, %p48_p1 }
  0x10   : > { %1492 = sst [smem:[#allocation7_spill]] %s1512_s12  ;;  %p1275_p9 = por %p219_p7, %p218_p6 }
  0x11   : > { %s36_s17 = ssub.s32 %s1158_s30, %s1512_s12  ;;  %s41_s19 = sadd.s32 1, %s1142_s26 }
  0x12   : > { %s38_s18 = sor.u32 %s37_s13, %s36_s17  ;;  %p919_p11 = scmp.ge.s32.totalorder %s1162_s8, 4 }
  0x13   : > { %p39_p10 = scmp.eq.s32.totalorder %s38_s18, 0 }
  0x14   : > { %250 = sbr.rel (%p919_p11) target bundleno = 36 (0x24), region = 36 }
  0x15   : > { %s1283_s20 = scalar_select %p39_p10, %s1142_s26, %s41_s19  }
  0x19   : > { %253 = sbr.rel (!%p1263_p3) target bundleno = 36 (0x24), region = 40  ;;  %s255_s21 = sand.u32 (%p1263_p3), 1, %s1142_s26  }
  0x1a   : > { %s921_s22 = sshll.u32 (%p1263_p3), %s1158_s30, 2  ;;  %s920_s23 = sshll.u32 (%p1263_p3), %s255_s21, 3 }
  0x1b   : > { %s259_s9 = sadd.s32 (%p1263_p3), %s1154_s29, %s921_s22  ;;  %s1495_s0 = sld [smem:[#allocation8_spill]] (%p1263_p3) }
  0x1c   : > { %s922_s10 = sshll.u32 (%p1263_p3), %s259_s9, 2  ;;  %s257_s18 = scalar_lea.vmem (%p1263_p3), [#allocation2], %s920_s23 }
  0x21   : > { %s261_s17 = scalar_lea.vmem %s1495_s0, %s922_s10 }
  0x22   : > { %v278_v0 = vld [vmem:[%s261_s17] sm:$0xf]  ;;  %v280_v1 = vld [vmem:[%s261_s17 + $0x8] sm:$0xf] }
  0x23   : > { %279 = vst [vmem:[%s257_s18] sm:$0xf] %v278_v0  ;;  %281 = vst [vmem:[%s257_s18 + $0x4] sm:$0xf] %v280_v1 }
  0x24 PF: > { %p923_p12 = scmp.ge.s32.totalorder %s1162_s8, 1  ;;  %p320_p13 = scmp.lt.s32.totalorder %s1162_s8, 5 }
  0x26   : > { %p321_p0 = pnand %p923_p12, %p320_p13 }
  0x27   : > { %s1297_s12 = sand.u32 (!%p321_p0), 1, %s1138_s25   ;;  %s1164_s21 = smov (!%p321_p0), 8  }
  0x28   : > { %324 = sbr.rel (%p321_p0) target bundleno = 865 (0x361), region = 85  ;;  %s924_s14 = sshll.u32 (!%p321_p0), %s1297_s12, 3 }
  0x29   : > { %s329_s19 = scalar_lea.vmem (!%p321_p0), [#allocation2], %s924_s14  ;;  %p367_p1 = scmp.lt.s32.totalorder (!%p321_p0), %s1150_s28, 1 }
  0x2a   : > { %p369_p2 = scmp.lt.s32.totalorder (!%p321_p0), %s1146_s27, 1  ;;  %s1166_s14 = smov (!%p321_p0), 124  }
  0x2d   : > { %v1062_v2 = vld [vmem:[%s329_s19] sm:$0xff]   ;;  %s368_s22 = scalar_select %p367_p1, %s1150_s28, 1  ;;  %vm394_vm0 = vcmask 64512   ;;  %v1165_v4 = vmov 0   ;;  %v532_v7 = vld [vmem:[%s1482_s3 + $0x10] sm:$0xff]  ;;  %v533_v8 = vld [vmem:[%s1482_s3 + $0x18] sm:$0xff]  ;;  %v571_v29 = vlaneseq }
  0x2e   : > { %391 = vrot.lane.b32.xlu0 %v1062_v2, %s1164_s21  ;;  %s370_s23 = scalar_select %p369_p2, %s1146_s27, 1  ;;  %489 = vmatprep.mubr.bf16.mxu0 %v1165_v4  ;;  %v530_v9 = vld [vmem:[%s1482_s3] sm:$0xff]  ;;  %v531_v10 = vld [vmem:[%s1482_s3 + $0x8] sm:$0xff]  ;;  %vm412_vm1 = vcmask 1014784   ;;  %vm404_vm2 = vcmask 1031168   ;;  %vm444_vm3 = vcmask 392192  }
  0x2f   : > { %s927_s9 = sshll.u32 %s368_s22, 2  ;;  %1060 = vset.pattern.permute.xlu1 %v1165_v4  ;;  %1061 = vset.pattern.permute.xlu0 %v1165_v4  ;;  %s1167_s19 = smov 126   ;;  %v1064_v17 = vld [vmem:[%s1481_s2] sm:$0xff]   ;;  %v1065_v18 = vld [vmem:[%s1481_s2 + $0x8] sm:$0xff]   ;;  %v1066_v19 = vld [vmem:[%s1481_s2 + $0x10] sm:$0xff]   ;;  %v572_v36 = vand.u32 127, %v571_v29 }
  0x30   : > { %s926_s10 = sshll.u32 %s370_s23, 1  ;;  %v1067_v20 = vld [vmem:[%s1481_s2 + $0x18] sm:$0xff]   ;;  %vm660_vm6 = vcmask 785408   ;;  %s925_s22 = sshll.u32 %s1297_s12, 5 }
  0x31   : > { %s373_s13 = sadd.s32 %s927_s9, %s926_s10  ;;  %v573_v45 = vadd.s32 128, %v572_v36 }
  0x32   : > { %s928_s17 = sshll.u32 %s373_s13, 2  ;;  %s798_s13 = scalar_lea.sflag [#allocation4], %s1297_s12 }
  0x33   : > { %s375_s11 = scalar_lea.vmem %s1480_s1, %s928_s17  ;;  %s939_s17 = sshll.u32 %s1146_s27, 7 }
  0x34   : > { %v1063_v3 = vld [vmem:[%s375_s11] sm:$0xff]   ;;  %s574_s18 = ssub.s32 4, %s939_s17  ;;  %s955_s11 = sshll.u32 %s1150_s28, 3 }
  0x35   : > { %v575_v42 = vstv %s574_s18  ;;  %s1168_s18 = smov [#allocation3]  }
  0x36   : > { %vm1341_vm4 = vcmp.lt.s32.totalorder %v572_v36, %v575_v42  ;;  %vm577_vm5 = vcmp.lt.s32.totalorder %v573_v45, %v575_v42  ;;  %s1074_s0 = sshll.u32 %s1168_s18, 4  ;;  %s1075_s0 = int_to_ptr.vmem [resolvable:$false] %s1074_s0 }
  0x37   : > { %vm942_vm7 = vmneg %vm1341_vm4 }
  0x38   : > { %vm944_vm8 = vmpackc.low %vm942_vm7, %vm942_vm7 }
  0xa0   : > { %v392_v5 = vpop.permute.xlu0 %391 }
  0xa1   : > { %410 = vrot.lane.b32.xlu1 %v392_v5, %s1166_s14  ;;  %v397_v6 = vsel %vm394_vm0, %v1063_v3, %v392_v5 }
  0xa2   : > { %408 = vrot.lane.b32.xlu0 %v397_v6, %s1166_s14 }
  0xa5   : > { %400 = vrot.lane.b32.xlu1 %v397_v6, %s1167_s19 }
  0xa6   : > { %402 = vrot.lane.b32.xlu0 %v392_v5, %s1167_s19 }
  0xa9   : > { %546 = vperm.xlu1 %1060, %v532_v7   ;;  %v722_v7 = vld [vmem:[%s1485_s6 + $0x10] sm:$0xff] }
  0xaa   : > { %551 = vperm.xlu0 %1061, %v533_v8   ;;  %v723_v8 = vld [vmem:[%s1485_s6 + $0x18] sm:$0xff] }
  0xad   : > { %536 = vperm.xlu1 %1060, %v530_v9   ;;  %v626_v9 = vld [vmem:[%s1484_s5] sm:$0xff] }
  0xb1   : > { %541 = vperm.xlu1 %1060, %v531_v10   ;;  %v627_v10 = vld [vmem:[%s1484_s5 + $0x8] sm:$0xff] }
 0x113   : > { %v411_v11 = vpop.permute.xlu1 %410 }
 0x114   : > { %v409_v12 = vpop.permute.xlu0 %408  ;;  %467 = vmatprep.subr.bf16.mxu0 %v411_v11 }
 0x115   : > { %v413_v13 = vsel %vm412_vm1, %v409_v12, %v411_v11  ;;  %v628_v11 = vld [vmem:[%s1484_s5 + $0x10] sm:$0xff]  ;;  %v629_v12 = vld [vmem:[%s1484_s5 + $0x18] sm:$0xff] }
 0x116   : > { %468 = vmatpush1.bf16.msra.mxu0 %v413_v13 }
 0x117   : > { %v401_v14 = vpop.permute.xlu1 %400 }
 0x118   : > { %v403_v15 = vpop.permute.xlu0 %402 }
 0x119   : > { %469 = vmatprep.subr.bf16.mxu0 %v403_v15  ;;  %v405_v16 = vsel %vm404_vm2, %v401_v14, %v403_v15 }
 0x11a   : > { %470 = vmatpush1.bf16.msra.mxu0 %v405_v16 }
 0x11b   : > { %471 = vmatprep.subr.bf16.mxu0 %v392_v5  ;;  %v720_v5 = vld [vmem:[%s1485_s6] sm:$0xff] }
 0x11e   : > { %472 = vmatpush1.bf16.msra.mxu0 %v397_v6  ;;  %v721_v6 = vld [vmem:[%s1485_s6 + $0x8] sm:$0xff] }
 0x121   : > { %935 = vmatmul.mubr.msk.bf16.vlgmr.msra.gmra.mxu0 %vm444_vm3, %v1064_v17 }
 0x122   : > { %499 = vmatprep.mubr.bf16.mxu0 %v1165_v4 }
 0x124   : > { %v547_v21 = vpop.permute.xlu1 %546 }
 0x125   : > { %v552_v38 = vpop.permute.xlu0 %551 }
 0x128   : > { %v537_v22 = vpop.permute.xlu1 %536 }
 0x129   : > { %936 = vmatmul.mubr.msk.bf16.gmra.mxu0 %vm444_vm3, %v1065_v18 }
 0x12a   : > { %509 = vmatprep.mubr.bf16.mxu0 %v1165_v4 }
 0x12c   : > { %v542_v25 = vpop.permute.xlu1 %541 }
 0x131   : > { %937 = vmatmul.mubr.msk.bf16.gmra.mxu0 %vm444_vm3, %v1066_v19 }
 0x132   : > { %519 = vmatprep.mubr.bf16.mxu0 %v1165_v4  ;;  %v1068_v4 = vld [vmem:[%s1483_s4] sm:$0xff]  }
 0x133   : > { %979 = vmatprep.mubr.msk.bf16.mxu1 %vm660_vm6, %v1068_v4 }
 0x139   : > { %938 = vmatmul.mubr.msk.bf16.gmra.mxu0 %vm444_vm3, %v1067_v20 }
 0x1e1   : > { %v491_v23 = vpop.f32.mrf.mxu0 }
 0x1e2   : > { %v554_v26 = vadd.f32 %v537_v22, %v491_v23 }
 0x1e3   : > { %v493_v24 = vpop.f32.mrf.mxu0 }
 0x1e4   : > { %v562_v31 = vmax.f32 %v554_v26, 0.0  ;;  %v555_v47 = vadd.f32 %v537_v22, %v493_v24 }
 0x1e5   : > { %v495_v27 = vpop.f32.mrf.mxu0 }
 0x1e6   : > { %v556_v28 = vadd.f32 %v542_v25, %v495_v27  ;;  %v563_v58 = vmax.f32 %v555_v47, 0.0  ;;  %v582_v63 = vsel %vm1341_vm4, 0.0, %v562_v31 }
 0x1e7   : > { %v497_v30 = vpop.f32.mrf.mxu0 }
 0x1e8   : > { %v564_v32 = vmax.f32 %v556_v28, 0.0  ;;  %v557_v40 = vadd.f32 %v542_v25, %v497_v30  ;;  %v583_v2 = vsel %vm577_vm5, 0.0, %v563_v58 }
 0x1e9   : > { %v501_v33 = vpop.f32.mrf.mxu0 }
 0x1ea   : > { %v1339_v34 = vpack.c.bf16 %v564_v32, %v562_v31  ;;  %v558_v35 = vadd.f32 %v547_v21, %v501_v33  ;;  %v565_v52 = vmax.f32 %v557_v40, 0.0  ;;  %v584_v59 = vsel %vm1341_vm4, 0.0, %v564_v32  ;;  %v1069_v31 = vld [vmem:[%s1483_s4 + $0x8] sm:$0xff]  }
 0x1eb   : > { %v503_v37 = vpop.f32.mrf.mxu0  ;;  %v590_v1 = vpack.c.bf16 %v584_v59, %v582_v63 }
 0x1ec   : > { %v559_v39 = vadd.f32 %v547_v21, %v503_v37  ;;  %v566_v43 = vmax.f32 %v558_v35, 0.0  ;;  %v585_v0 = vsel %vm577_vm5, 0.0, %v565_v52 }
 0x1ed   : > { %v505_v41 = vpop.f32.mrf.mxu0  ;;  %v591_v3 = vpack.c.bf16 %v585_v0, %v583_v2 }
 0x1ee   : > { %v560_v44 = vadd.f32 %v552_v38, %v505_v41  ;;  %v567_v48 = vmax.f32 %v559_v39, 0.0  ;;  %v586_v53 = vsel %vm1341_vm4, 0.0, %v566_v43 }
 0x1ef   : > { %v507_v46 = vpop.f32.mrf.mxu0 }
 0x1f0   : > { %v568_v49 = vmax.f32 %v560_v44, 0.0  ;;  %v561_v50 = vadd.f32 %v552_v38, %v507_v46  ;;  %v587_v60 = vsel %vm577_vm5, 0.0, %v567_v48 }
 0x1f1   : > { %v511_v19 = vpop.f32.mrf.mxu0 }
 0x1f2   : > { %v588_v54 = vsel %vm1341_vm4, 0.0, %v568_v49  ;;  %v1349_v55 = vpack.c.bf16 %v568_v49, %v566_v43  ;;  %v569_v56 = vmax.f32 %v561_v50, 0.0 }
 0x1f3   : > { %v592_v57 = vpack.c.bf16 %v588_v54, %v586_v53  ;;  %v513_v23 = vpop.f32.mrf.mxu0 }
 0x1f4   : > { %v589_v61 = vsel %vm577_vm5, 0.0, %v569_v56 }
 0x1f5   : > { %614 = vrot.lane.b32.xlu0 %v592_v57, %s1166_s14  ;;  %v593_v62 = vpack.c.bf16 %v589_v61, %v587_v60  ;;  %v515_v27 = vpop.f32.mrf.mxu0 }
 0x1f7   : > { %616 = vrot.lane.b32.xlu1 %v593_v62, %s1166_s14  ;;  %v517_v28 = vpop.f32.mrf.mxu0 }
 0x1f9   : > { %610 = vrot.lane.b32.xlu0 %v590_v1, %s1166_s14  ;;  %v521_v29 = vpop.f32.mrf.mxu0 }
 0x1fb   : > { %612 = vrot.lane.b32.xlu1 %v591_v3, %s1166_s14  ;;  %v523_v35 = vpop.f32.mrf.mxu0 }
 0x1fd   : > { %602 = vrot.lane.b32.xlu0 %v592_v57, %s1167_s19  ;;  %v525_v39 = vpop.f32.mrf.mxu0 }
 0x1ff   : > { %604 = vrot.lane.b32.xlu1 %v593_v62, %s1167_s19  ;;  %v527_v42 = vpop.f32.mrf.mxu0 }
 0x201   : > { %598 = vrot.lane.b32.xlu0 %v590_v1, %s1167_s19 }
 0x203   : > { %600 = vrot.lane.b32.xlu1 %v591_v3, %s1167_s19  ;;  %s366_s19 = scalar_lea.vmem [#allocation3], %s925_s22  ;;  %s1076_s22 = scalar_lea.vmem %s1075_s0, 1024 }
 0x204   : > { %s812_s28 = sshll.u32 %s366_s19, 4  ;;  %s1420_s28 = int_to_ptr.vmem [resolvable:$true] %s812_s28 }
 0x205   : > { %726 = vperm.xlu0 %1061, %v720_v5   ;;  %s1070_s17 = scalar_lea.vmem %s1420_s28, 512  ;;  %p1077_p6 = scmp.lt.s32.totalorder %s1420_s28, %s1075_s0 }
 0x206   : > { %p1071_p3 = scmp.ne.s32.totalorder %s1420_s28, %s1070_s17  ;;  %p1078_p7 = scmp.lt.s32.totalorder %s1076_s22, %s1070_s17 }
 0x207   : > { %731 = vperm.xlu1 %1060, %v721_v6  }
 0x208   : > { %p1072_p4 = pnand %p1071_p3, %p1271_p8  ;;  %p1079_p10 = por %p1078_p7, %p1077_p6 }
 0x209   : > { %736 = vperm.xlu0 %1061, %v722_v7  }
 0x20a   : > { %p1073_p5 = pneg %p1072_p4 }
 0x20b   : > { %741 = vperm.xlu1 %1060, %v723_v8  }
 0x20c   : > { %p1080_p11 = pnand %p1079_p10, %p1073_p5 }
 0x20d   : > { %632 = vperm.xlu0 %1061, %v626_v9  }
 0x20f   : > { %637 = vperm.xlu1 %1060, %v627_v10  }
 0x211   : > { %642 = vperm.xlu0 %1061, %v628_v11  }
 0x213   : > { %647 = vperm.xlu1 %1060, %v629_v12  }
 0x267   : > { %v615_v13 = vpop.permute.xlu0 %614 }
 0x269   : > { %v617_v14 = vpop.permute.xlu1 %616 }
 0x26a   : > { %v619_v15 = vsel %vm412_vm1, %v615_v13, %v617_v14 }
 0x26b   : > { %v611_v16 = vpop.permute.xlu0 %610  ;;  %967 = vmatprep.subr.bf16.mxu1 %v619_v15 }
 0x26c   : > { %968 = vmatpush3.bf16.msra.mxu1 %v619_v15 }
 0x26d   : > { %v613_v17 = vpop.permute.xlu1 %612 }
 0x26e   : > { %v618_v18 = vsel %vm412_vm1, %v611_v16, %v613_v17 }
 0x26f   : > { %v603_v20 = vpop.permute.xlu0 %602  ;;  %969 = vmatprep.subr.bf16.mxu1 %v618_v18 }
 0x270   : > { %970 = vmatpush3.bf16.msra.mxu1 %v618_v18 }
 0x271   : > { %v605_v21 = vpop.permute.xlu1 %604 }
 0x272   : > { %v607_v22 = vsel %vm404_vm2, %v603_v20, %v605_v21 }
 0x273   : > { %971 = vmatprep.subr.bf16.mxu1 %v607_v22  ;;  %v599_v24 = vpop.permute.xlu0 %598 }
 0x274   : > { %972 = vmatpush3.bf16.msra.mxu1 %v607_v22 }
 0x275   : > { %v601_v25 = vpop.permute.xlu1 %600 }
 0x276   : > { %v606_v26 = vsel %vm404_vm2, %v599_v24, %v601_v25 }
 0x277   : > { %973 = vmatprep.subr.bf16.mxu1 %v606_v26 }
 0x278   : > { %974 = vmatpush3.bf16.msra.mxu1 %v606_v26 }
 0x279   : > { %975 = vmatprep.subr.msk.bf16.mxu1 %vm944_vm8, %v1349_v55 }
 0x27c   : > { %976 = vmatpush3.bf16.msk.msra.mxu1 %vm944_vm8, %v1349_v55 }
 0x27d   : > { %977 = vmatprep.subr.msk.bf16.mxu1 %vm944_vm8, %v1339_v34 }
 0x280   : > { %v727_v30 = vpop.permute.xlu0 %726  ;;  %978 = vmatpush3.bf16.msk.msra.mxu1 %vm944_vm8, %v1339_v34 }
 0x281   : > { %v744_v32 = vadd.f32 %v727_v30, %v511_v19  ;;  %v745_v33 = vadd.f32 %v727_v30, %v513_v23 }
 0x282   : > { %v732_v36 = vpop.permute.xlu1 %731 }
 0x283   : > { %762 = vrot.lane.b32.xlu1 %v745_v33, %s1166_s14  ;;  %760 = vrot.lane.b32.xlu0 %v744_v32, %s1166_s14  ;;  %v746_v37 = vadd.f32 %v732_v36, %v515_v27  ;;  %v747_v38 = vadd.f32 %v732_v36, %v517_v28 }
 0x284   : > { %980 = vmatmul.mubr.msk.bf16.vlgmr.msra.gmra.mxu1 %vm660_vm6, %v1069_v31  ;;  %v737_v40 = vpop.permute.xlu0 %736 }
 0x285   : > { %v748_v34 = vadd.f32 %v737_v40, %v521_v29  ;;  %v749_v41 = vadd.f32 %v737_v40, %v523_v35 }
 0x286   : > { %v742_v43 = vpop.permute.xlu1 %741 }
 0x287   : > { %766 = vrot.lane.b32.xlu1 %v747_v38, %s1166_s14  ;;  %764 = vrot.lane.b32.xlu0 %v746_v37, %s1166_s14  ;;  %v750_v44 = vadd.f32 %v742_v43, %v525_v39  ;;  %v751_v45 = vadd.f32 %v742_v43, %v527_v42 }
 0x288   : > { %v633_v46 = vpop.permute.xlu0 %632 }
 0x28a   : > { %v638_v47 = vpop.permute.xlu1 %637 }
 0x28b   : > { %770 = vrot.lane.b32.xlu1 %v749_v41, %s1166_s14  ;;  %768 = vrot.lane.b32.xlu0 %v748_v34, %s1166_s14 }
 0x28c   : > { %v643_v48 = vpop.permute.xlu0 %642 }
 0x28e   : > { %v648_v49 = vpop.permute.xlu1 %647 }
 0x28f   : > { %774 = vrot.lane.b32.xlu1 %v751_v45, %s1166_s14  ;;  %772 = vrot.lane.b32.xlu0 %v750_v44, %s1166_s14  ;;  %s809_s14 = sadd.s32 %s1146_s27, %s955_s11 }
 0x290   : > { %s956_s23 = sshll.u32 %s809_s14, 7 }
 0x291   : > { %s1425_s10 = scalar_lea.hbm %s1486_s7, %s956_s23 }
 0x2f5   : > { %v761_v50 = vpop.permute.xlu0 %760  ;;  %v763_v51 = vpop.permute.xlu1 %762 }
 0x2f6   : > { %v777_v4 = vsel %vm412_vm1, %v761_v50, %v763_v51 }
 0x2f9   : > { %v765_v52 = vpop.permute.xlu0 %764  ;;  %v767_v53 = vpop.permute.xlu1 %766 }
 0x2fa   : > { %v778_v14 = vsel %vm412_vm1, %v765_v52, %v767_v53 }
 0x2fd   : > { %v769_v54 = vpop.permute.xlu0 %768  ;;  %v771_v55 = vpop.permute.xlu1 %770 }
 0x2fe   : > { %v779_v61 = vsel %vm412_vm1, %v769_v54, %v771_v55 }
 0x301   : > { %v773_v63 = vpop.permute.xlu0 %772  ;;  %v775_v0 = vpop.permute.xlu1 %774 }
 0x302   : > { %v780_v10 = vsel %vm412_vm1, %v773_v63, %v775_v0 }
 0x344   : > { %v981_v56 = vpop.f32.mrf.mxu1 }
 0x345   : > { %v710_v57 = vadd.f32 %v981_v56, %v643_v48 }
 0x346   : > { %v701_v58 = vpop.f32.mrf.mxu1 }
 0x347   : > { %v718_v59 = vmax.f32 %v710_v57, 0.0  ;;  %v702_v60 = vadd.f32 %v701_v58, %v633_v46 }
 0x348   : > { %v982_v62 = vpop.f32.mrf.mxu1 }
 0x349   : > { %v787_v1 = vadd.f32 %v779_v61, %v718_v59  ;;  %v716_v2 = vmax.f32 %v702_v60, 0.0  ;;  %v713_v3 = vadd.f32 %v982_v62, %v648_v49 }
 0x34a   : > { %v704_v5 = vpop.f32.mrf.mxu1 }
 0x34b   : > { %v791_v6 = vmax.f32 %v787_v1, 0.0  ;;  %v785_v7 = vadd.f32 %v777_v4, %v716_v2  ;;  %v719_v8 = vmax.f32 %v713_v3, 0.0  ;;  %v705_v9 = vadd.f32 %v704_v5, %v638_v47 }
 0x34d   : > { %795 = vst [vmem:[%s366_s19 + $0x10] sm:$0xff] %v791_v6  ;;  %v789_v11 = vmax.f32 %v785_v7, 0.0  ;;  %v788_v12 = vadd.f32 %v780_v10, %v719_v8  ;;  %v717_v13 = vmax.f32 %v705_v9, 0.0 }
 0x34f   : > { %793 = vst [vmem:[%s366_s19] sm:$0xff] %v789_v11  ;;  %v792_v15 = vmax.f32 %v788_v12, 0.0  ;;  %v786_v16 = vadd.f32 %v778_v14, %v717_v13 }
 0x351   : > { %796 = vst [vmem:[%s366_s19 + $0x18] sm:$0xff] %v792_v15  ;;  %v790_v17 = vmax.f32 %v786_v16, 0.0 }
 0x353   : > { %794 = vst [vmem:[%s366_s19 + $0x8] sm:$0xff] %v790_v17 }
 0x354   : > { %1083 = shalt.err (!%p1080_p11)
}
 0x355   : > { %s1084_s11 = scalar_lea.hbm %s1425_s10, 512  ;;  %s1088_s23 = scalar_lea.hbm %s1486_s7, 2048 }
 0x356   : > { %p1085_p12 = scmp.ne.s32.totalorder %s1425_s10, %s1084_s11  ;;  %p1089_p1 = scmp.lt.s32.totalorder %s1425_s10, %s1486_s7 }
 0x357   : > { %p1090_p2 = scmp.lt.s32.totalorder %s1088_s23, %s1084_s11 }
 0x358   : > { %p1086_p13 = pnand %p1085_p12, %p1271_p8 }
 0x359   : > { %p1091_p3 = por %p1090_p2, %p1089_p1 }
 0x35a   : > { %p1087_p0 = pneg %p1086_p13 }
 0x35c   : > { %p1092_p4 = pnand %p1091_p3, %p1087_p0 }
 0x35e   : > { %1095 = shalt.err (!%p1092_p4)
}
 0x35f   : > { %s1169_s17 = smov 128   ;;  %s1170_s18 = smov 256  }
 0x360   : > { %983 = dma.vmem_to_hbm [thread:$0]  (%p1271_p8), %s1420_s28, 512, %s1425_s10, %s798_s13, %s1169_s17, %s1170_s18, %s1164_s21  }
 0x361 PF: > { %p989_p5 = scmp.ge.s32.totalorder %s1162_s8, 2  ;;  %s827_s0 = sand.u32 1, %s1134_s24  }
 0x362   : > { %s828_s22 = scalar_lea.sflag [#allocation4], %s827_s0 }
 0x363   : > { %p986_p6 = pnand %p989_p5, %p1275_p9 }
 0x365   : > { %p987_p7 = pneg %p986_p6 }
 0x367   : > { %1129 = dma.done.wait (%p987_p7), %s828_s22, 512  }
 0x368   : > { %1131 = vsyncadd (%p987_p7), %s828_s22, 4294966784  ;;  %s20_s8 = sadd.s32 1, %s1162_s8   ;;  %s1498_s15 = sld [smem:[#allocation6_spill]] }
 0x369   : > { %p17_p10 = scmp.ge.s32.totalorder %s20_s8, 6   ;;  %s1499_s12 = sld [smem:[#allocation7_spill]] }
 0x36a   : > { %s1500_s24 = smov %s1138_s25  ;;  %s1501_s25 = smov %s1142_s26 }
 0x36b   : > { %s1502_s26 = smov %s1283_s20  ;;  %s1503_s27 = smov %s1154_s29 }
 0x36c   : > { %s1504_s28 = smov %s1158_s30  ;;  %19 = sbr.rel (!%p17_p10) target bundleno = 7 (0x7), region = 132 }
 0x36e   : > { %s1505_s29 = smov %s1498_s15 }
 0x36f   : > { %s1506_s30 = smov %s1499_s12 }
 0x371   :  { %833 = vsyncpa [#allocation4], 1 }
 0x372   :  { %835 = vsyncpa [#allocation4 + $0x1], 1 }

</bundles_post_ra>
